<compile_context>
chip_gen: v6e
topology: v6e:2x2x1
jax: 0.10.0
libtpu: 0.0.40
codegen_flags: <defaults>
</compile_context>

<pallas_src>
import jax
import jax.numpy as jnp
from jax.experimental import pallas as pl
from jax.experimental.pallas import tpu as pltpu
import numpy as np


def _shift_kernel(x_ref, o_ref):
    """One (tb, W, H, C) block: per-channel-group directional shift.

    Every write below is a direct ref->ref offset slice copy.  W shifts move
    data along a major (non-tiled) axis; H shifts are sublane-offset copies;
    no temporaries are materialized.
    """
    tb, w, h, c = x_ref.shape
    q1, q2, q3 = c // 4, c // 2, (3 * c) // 4

    # Group 0: channels [0, q1)   -> out[:, i] = x[:, i-1] (i >= 1), row 0 kept.
    if q1 > 0:
        o_ref[:, 0:1, :, 0:q1] = x_ref[:, 0:1, :, 0:q1]
        if w > 1:
            o_ref[:, 1:, :, 0:q1] = x_ref[:, 0:w - 1, :, 0:q1]

    # Group 1: channels [q1, q2)  -> out[:, i] = x[:, i+1] (i < w-1), last row kept.
    if q2 > q1:
        o_ref[:, w - 1:w, :, q1:q2] = x_ref[:, w - 1:w, :, q1:q2]
        if w > 1:
            o_ref[:, 0:w - 1, :, q1:q2] = x_ref[:, 1:, :, q1:q2]

    # Group 2: channels [q2, q3)  -> out[:, :, j] = x[:, :, j-1] (j >= 1), col 0 kept.
    if q3 > q2:
        o_ref[:, :, 0:1, q2:q3] = x_ref[:, :, 0:1, q2:q3]
        if h > 1:
            o_ref[:, :, 1:, q2:q3] = x_ref[:, :, 0:h - 1, q2:q3]

    # Group 3: channels [q3, c)   -> out[:, :, j] = x[:, :, j+1] (j < h-1), last col kept.
    if c > q3:
        o_ref[:, :, h - 1:h, q3:c] = x_ref[:, :, h - 1:h, q3:c]
        if h > 1:
            o_ref[:, :, 0:h - 1, q3:c] = x_ref[:, :, 1:, q3:c]


def _choose_batch_tile(b, w, h, c, itemsize):
    """Pick tb (batch elements per block).

    Targets ~4 MB per block (big enough that the ~0.35 us/step overhead is
    <10% even at v7x HBM bandwidth) while keeping 2 in + 2 out double-buffered
    blocks under ~24 MiB (fits v7x's 64 MiB physical VMEM with headroom), and
    keeps >= 2 grid steps when B >= 2 so v7x's two TensorCores both get work.
    """
    per_batch = w * h * c * itemsize
    vmem_budget = 24 << 20       # total for 4 double-buffered blocks
    target_block = 4 << 20       # desired bytes per block
    tb = min(b, max(1, min(vmem_budget // (4 * per_batch),
                           target_block // per_batch)))
    if b >= 2 and tb >= b:
        tb = (b + 1) // 2        # keep a parallel grid axis of extent >= 2
    while b % tb != 0:           # snap to a divisor of b (no ragged last block)
        tb -= 1
    return tb


def spatial_shift_block1(x):
    """Pallas implementation of SpatialShiftBlock1.forward.  x: (B, W, H, C)."""
    b, w, h, c = x.shape
    itemsize = x.dtype.itemsize
    tb = _choose_batch_tile(b, w, h, c, itemsize)
    block_bytes = tb * w * h * c * itemsize
    nbytes = b * w * h * c * itemsize
    # Explicit scoped-VMEM limit: enough for double-buffered in+out blocks,
    # never below the 32 MiB that is safe on every generation.
    vmem_limit = int(max(32 << 20, min(100 << 20, 5 * block_bytes)))

    return pl.pallas_call(
        _shift_kernel,
        out_shape=jax.ShapeDtypeStruct((b, w, h, c), x.dtype),
        grid_spec=pltpu.PrefetchScalarGridSpec(
            num_scalar_prefetch=0,
            grid=(b // tb,),
            in_specs=[pl.BlockSpec((tb, w, h, c), lambda i: (i, 0, 0, 0))],
            out_specs=pl.BlockSpec((tb, w, h, c), lambda i: (i, 0, 0, 0)),
        ),
        compiler_params=pltpu.CompilerParams(
            dimension_semantics=("parallel",),
            vmem_limit_bytes=vmem_limit),
        cost_estimate=pl.CostEstimate(
            flops=0, transcendentals=0, bytes_accessed=2 * int(nbytes)),
    )(x)


def _reference(x):
    """Pure-JAX reference of the read-from-original semantics."""
    b, w, h, c = x.shape
    out = x
    out = out.at[:, 1:, :, : c // 4].set(x[:, : w - 1, :, : c // 4])
    out = out.at[:, : w - 1, :, c // 4: c // 2].set(x[:, 1:, :, c // 4: c // 2])
    out = out.at[:, :, 1:, c // 2: (3 * c) // 4].set(
        x[:, :, : h - 1, c // 2: (3 * c) // 4])
    out = out.at[:, :, : h - 1, (3 * c) // 4:].set(x[:, :, 1:, (3 * c) // 4:])
    return out


if __name__ == "__main__":
    key = jax.random.PRNGKey(0)
    k1, k2 = jax.random.split(key)

    # Small, non-lane-dense channels (masked lane stores path).
    x_small = jax.random.normal(k1, (2, 16, 16, 8), dtype=jnp.float32)
    out_small = jax.block_until_ready(spatial_shift_block1(x_small))
    np.testing.assert_allclose(
        np.asarray(out_small), np.asarray(_reference(x_small)), rtol=0, atol=0)

    # Lane-dense channels ((C//4) % 128 == 0 -> unmasked lane-dense stores).
    x_dense = jax.random.normal(k2, (2, 8, 8, 512), dtype=jnp.float32)
    out_dense = jax.block_until_ready(spatial_shift_block1(x_dense))
    np.testing.assert_allclose(
        np.asarray(out_dense), np.asarray(_reference(x_dense)), rtol=0, atol=0)

    print("KERNEL_OK")
</pallas_src>

<mosaic_0001>
module attributes {stable_mosaic.version = 11 : i64} {
  func.func @_shift_kernel(%arg0: i32, %arg1: memref<1x16x16x8xf32, #tpu.memory_space<vmem>>, %arg2: memref<1x16x16x8xf32, #tpu.memory_space<vmem>>) attributes {dimension_semantics = [#tpu.dimension_semantics<parallel>], iteration_bounds = array<i64: 2>, scalar_prefetch = 0 : i64, scratch_operands = 0 : i64, tpu.core_type = #tpu.core_type<tc>, window_params = [{transform_indices = @transform_0, window_bounds = array<i64: 1, 16, 16, 8>}, {transform_indices = @transform_1, window_bounds = array<i64: 1, 16, 16, 8>}]} {
    %c0 = arith.constant 0 : index
    %c0_0 = arith.constant 0 : index
    %c0_1 = arith.constant 0 : index
    %c0_2 = arith.constant 0 : index
    %0 = vector.load %arg1[%c0, %c0_0, %c0_1, %c0_2] : memref<1x16x16x8xf32, #tpu.memory_space<vmem>>, vector<1x1x16x2xf32>
    %c0_3 = arith.constant 0 : index
    %c0_4 = arith.constant 0 : index
    %c0_5 = arith.constant 0 : index
    %c0_6 = arith.constant 0 : index
    %1 = vector.load %arg2[%c0_3, %c0_4, %c0_5, %c0_6] : memref<1x16x16x8xf32, #tpu.memory_space<vmem>>, vector<1x1x16x2xf32>
    tpu.vector_store %arg2[%c0_3, %c0_4, %c0_5, %c0_6], %0 {strides = array<i32>} : memref<1x16x16x8xf32, #tpu.memory_space<vmem>>, vector<1x1x16x2xf32>,
    %c0_7 = arith.constant 0 : index
    %c0_8 = arith.constant 0 : index
    %c0_9 = arith.constant 0 : index
    %c0_10 = arith.constant 0 : index
    %2 = vector.load %arg1[%c0_7, %c0_8, %c0_9, %c0_10] : memref<1x16x16x8xf32, #tpu.memory_space<vmem>>, vector<1x15x16x2xf32>
    %c0_11 = arith.constant 0 : index
    %c1 = arith.constant 1 : index
    %c0_12 = arith.constant 0 : index
    %c0_13 = arith.constant 0 : index
    %3 = vector.load %arg2[%c0_11, %c1, %c0_12, %c0_13] : memref<1x16x16x8xf32, #tpu.memory_space<vmem>>, vector<1x15x16x2xf32>
    tpu.vector_store %arg2[%c0_11, %c1, %c0_12, %c0_13], %2 {strides = array<i32>} : memref<1x16x16x8xf32, #tpu.memory_space<vmem>>, vector<1x15x16x2xf32>,
    %c0_14 = arith.constant 0 : index
    %c15 = arith.constant 15 : index
    %c0_15 = arith.constant 0 : index
    %c2 = arith.constant 2 : index
    %4 = vector.load %arg1[%c0_14, %c15, %c0_15, %c2] : memref<1x16x16x8xf32, #tpu.memory_space<vmem>>, vector<1x1x16x2xf32>
    %c0_16 = arith.constant 0 : index
    %c15_17 = arith.constant 15 : index
    %c0_18 = arith.constant 0 : index
    %c2_19 = arith.constant 2 : index
    %5 = vector.load %arg2[%c0_16, %c15_17, %c0_18, %c2_19] : memref<1x16x16x8xf32, #tpu.memory_space<vmem>>, vector<1x1x16x2xf32>
    tpu.vector_store %arg2[%c0_16, %c15_17, %c0_18, %c2_19], %4 {strides = array<i32>} : memref<1x16x16x8xf32, #tpu.memory_space<vmem>>, vector<1x1x16x2xf32>,
    %c0_20 = arith.constant 0 : index
    %c1_21 = arith.constant 1 : index
    %c0_22 = arith.constant 0 : index
    %c2_23 = arith.constant 2 : index
    %6 = vector.load %arg1[%c0_20, %c1_21, %c0_22, %c2_23] : memref<1x16x16x8xf32, #tpu.memory_space<vmem>>, vector<1x15x16x2xf32>
    %c0_24 = arith.constant 0 : index
    %c0_25 = arith.constant 0 : index
    %c0_26 = arith.constant 0 : index
    %c2_27 = arith.constant 2 : index
    %7 = vector.load %arg2[%c0_24, %c0_25, %c0_26, %c2_27] : memref<1x16x16x8xf32, #tpu.memory_space<vmem>>, vector<1x15x16x2xf32>
    tpu.vector_store %arg2[%c0_24, %c0_25, %c0_26, %c2_27], %6 {strides = array<i32>} : memref<1x16x16x8xf32, #tpu.memory_space<vmem>>, vector<1x15x16x2xf32>,
    %c0_28 = arith.constant 0 : index
    %c0_29 = arith.constant 0 : index
    %c0_30 = arith.constant 0 : index
    %c4 = arith.constant 4 : index
    %8 = vector.load %arg1[%c0_28, %c0_29, %c0_30, %c4] : memref<1x16x16x8xf32, #tpu.memory_space<vmem>>, vector<1x16x1x2xf32>
    %c0_31 = arith.constant 0 : index
    %c0_32 = arith.constant 0 : index
    %c0_33 = arith.constant 0 : index
    %c4_34 = arith.constant 4 : index
    %9 = vector.load %arg2[%c0_31, %c0_32, %c0_33, %c4_34] : memref<1x16x16x8xf32, #tpu.memory_space<vmem>>, vector<1x16x1x2xf32>
    tpu.vector_store %arg2[%c0_31, %c0_32, %c0_33, %c4_34], %8 {strides = array<i32>} : memref<1x16x16x8xf32, #tpu.memory_space<vmem>>, vector<1x16x1x2xf32>,
    %c0_35 = arith.constant 0 : index
    %c0_36 = arith.constant 0 : index
    %c0_37 = arith.constant 0 : index
    %c4_38 = arith.constant 4 : index
    %10 = vector.load %arg1[%c0_35, %c0_36, %c0_37, %c4_38] : memref<1x16x16x8xf32, #tpu.memory_space<vmem>>, vector<1x16x15x2xf32>
    %c0_39 = arith.constant 0 : index
    %c0_40 = arith.constant 0 : index
    %c1_41 = arith.constant 1 : index
    %c4_42 = arith.constant 4 : index
    %11 = vector.load %arg2[%c0_39, %c0_40, %c1_41, %c4_42] : memref<1x16x16x8xf32, #tpu.memory_space<vmem>>, vector<1x16x15x2xf32>
    tpu.vector_store %arg2[%c0_39, %c0_40, %c1_41, %c4_42], %10 {strides = array<i32>} : memref<1x16x16x8xf32, #tpu.memory_space<vmem>>, vector<1x16x15x2xf32>,
    %c0_43 = arith.constant 0 : index
    %c0_44 = arith.constant 0 : index
    %c15_45 = arith.constant 15 : index
    %c6 = arith.constant 6 : index
    %12 = vector.load %arg1[%c0_43, %c0_44, %c15_45, %c6] : memref<1x16x16x8xf32, #tpu.memory_space<vmem>>, vector<1x16x1x2xf32>
    %c0_46 = arith.constant 0 : index
    %c0_47 = arith.constant 0 : index
    %c15_48 = arith.constant 15 : index
    %c6_49 = arith.constant 6 : index
    %13 = vector.load %arg2[%c0_46, %c0_47, %c15_48, %c6_49] : memref<1x16x16x8xf32, #tpu.memory_space<vmem>>, vector<1x16x1x2xf32>
    tpu.vector_store %arg2[%c0_46, %c0_47, %c15_48, %c6_49], %12 {strides = array<i32>} : memref<1x16x16x8xf32, #tpu.memory_space<vmem>>, vector<1x16x1x2xf32>,
    %c0_50 = arith.constant 0 : index
    %c0_51 = arith.constant 0 : index
    %c1_52 = arith.constant 1 : index
    %c6_53 = arith.constant 6 : index
    %14 = vector.load %arg1[%c0_50, %c0_51, %c1_52, %c6_53] : memref<1x16x16x8xf32, #tpu.memory_space<vmem>>, vector<1x16x15x2xf32>
    %c0_54 = arith.constant 0 : index
    %c0_55 = arith.constant 0 : index
    %c0_56 = arith.constant 0 : index
    %c6_57 = arith.constant 6 : index
    %15 = vector.load %arg2[%c0_54, %c0_55, %c0_56, %c6_57] : memref<1x16x16x8xf32, #tpu.memory_space<vmem>>, vector<1x16x15x2xf32>
    tpu.vector_store %arg2[%c0_54, %c0_55, %c0_56, %c6_57], %14 {strides = array<i32>} : memref<1x16x16x8xf32, #tpu.memory_space<vmem>>, vector<1x16x15x2xf32>,
    return
  }
  func.func @transform_0(%arg0: i32) -> (i32, i32, i32, i32) {
    %c0_i32 = arith.constant 0 : i32
    %c0_i32_0 = arith.constant 0 : i32
    %c0_i32_1 = arith.constant 0 : i32
    %c0_i32_2 = arith.constant 0 : i32
    return %arg0, %c0_i32, %c0_i32_0, %c0_i32_1 : i32, i32, i32, i32
  }
  func.func @transform_1(%arg0: i32) -> (i32, i32, i32, i32) {
    %c0_i32 = arith.constant 0 : i32
    %c0_i32_0 = arith.constant 0 : i32
    %c0_i32_1 = arith.constant 0 : i32
    %c0_i32_2 = arith.constant 0 : i32
    return %arg0, %c0_i32, %c0_i32_0, %c0_i32_1 : i32, i32, i32, i32
  }
}

</mosaic_0001>

<bundles_post_ra>
// kernel: tpu_custom_call.1
= control target key start
LH: loop header
LB: loop body
LE: loop exit
PB: predicated region body
PF: predicated region fallthrough
CT: control target
= control target key end

     0   :  { %s607_s6 = smov 0   ;;  %s1060_s0 = inlined_call_operand.vmem [shape: f32[2,16,16,8], index: 0, kind: input, shape index: {}]   ;;  %s1061_s1 = inlined_call_operand.vmem [shape: f32[2,16,16,8], index: 1, kind: output, shape index: {}]  }
   0x1 LB: > { %s504_s7 = sadd.s32 4294967295, %s595_s6   ;;  %p508_p0 = scmp.ge.s32.totalorder %s595_s6, 1  ;;  %s595_s6 = sphi %s607_s6, %s11_s6  }
   0x2   : > { %p87_p1 = scmp.lt.s32.totalorder %s595_s6, 3 }
   0x4   : > { %p88_p2 = pnand %p508_p0, %p87_p1 }
   0x5   : > { %p107_p3 = scmp.lt.s32.totalorder (!%p88_p2), %s504_s7, 1 }
   0x6   : > { %91 = sbr.rel (%p88_p2) target bundleno = 95 (0x5f), region = 24 }
   0xb   : > { %s1063_s7 = smov (!%p107_p3, %s504_s7), 1  ;;  %vm119_vm0 = vcmask 15360   ;;  %vm187_vm1 = vcmask 31760   ;;  %vm316_vm2 = vcmask 48160   ;;  %vm267_vm3 = vcmask 40992  }
   0xc   : > { %s579_s8 = sshll.u32 %s1063_s7, 8  ;;  %vm318_vm4 = vcmask 47136   ;;  %vm366_vm5 = vcmask 57392   ;;  %vm415_vm6 = vcmask 64560   ;;  %vm417_vm7 = vcmask 63536  }
   0xd   : > { %s618_s11 = scalar_lea.vmem %s1060_s0, %s579_s8  ;;  %s623_s14 = scalar_lea.vmem %s1061_s1, %s579_s8 }
   0xe   : > { %v117_v0 = vld [vmem:[%s618_s11] sm:$0xff]  ;;  %v118_v1 = vld [vmem:[%s618_s11 + $0x8] sm:$0xff]  ;;  %v124_v2 = vld [vmem:[%s618_s11 + $0x10] sm:$0xff] }
   0xf   : > { %120 = vst.msk [vmem:[%s623_s14] sm:$0xff] %vm119_vm0, %v117_v0  ;;  %121 = vst.msk [vmem:[%s623_s14 + $0x8] sm:$0xff] %vm119_vm0, %v118_v1  ;;  %v125_v3 = vld [vmem:[%s618_s11 + $0x18] sm:$0xff]  ;;  %v126_v4 = vld [vmem:[%s618_s11 + $0x20] sm:$0xff] }
  0x10   : > { %513 = vst.msk [vmem:[%s623_s14 + $0x10] sm:$0xff] %vm119_vm0, %v117_v0  ;;  %514 = vst.msk [vmem:[%s623_s14 + $0x18] sm:$0xff] %vm119_vm0, %v118_v1  ;;  %v127_v5 = vld [vmem:[%s618_s11 + $0x28] sm:$0xff]  ;;  %v128_v6 = vld [vmem:[%s618_s11 + $0x30] sm:$0xff] }
  0x11   : > { %515 = vst.msk [vmem:[%s623_s14 + $0x20] sm:$0xff] %vm119_vm0, %v124_v2  ;;  %516 = vst.msk [vmem:[%s623_s14 + $0x28] sm:$0xff] %vm119_vm0, %v125_v3  ;;  %v129_v7 = vld [vmem:[%s618_s11 + $0x38] sm:$0xff]  ;;  %v130_v8 = vld [vmem:[%s618_s11 + $0x40] sm:$0xff] }
  0x12   : > { %517 = vst.msk [vmem:[%s623_s14 + $0x30] sm:$0xff] %vm119_vm0, %v126_v4  ;;  %518 = vst.msk [vmem:[%s623_s14 + $0x38] sm:$0xff] %vm119_vm0, %v127_v5  ;;  %v131_v9 = vld [vmem:[%s618_s11 + $0x48] sm:$0xff]  ;;  %v132_v10 = vld [vmem:[%s618_s11 + $0x50] sm:$0xff] }
  0x13   : > { %221 = vst.msk [vmem:[%s623_s14] sm:$0xff] %vm187_vm1, %v124_v2  ;;  %222 = vst.msk [vmem:[%s623_s14 + $0x8] sm:$0xff] %vm187_vm1, %v125_v3  ;;  %v133_v11 = vld [vmem:[%s618_s11 + $0x58] sm:$0xff]  ;;  %v134_v12 = vld [vmem:[%s618_s11 + $0x60] sm:$0xff] }
  0x14   : > { %223 = vst.msk [vmem:[%s623_s14 + $0x10] sm:$0xff] %vm187_vm1, %v126_v4  ;;  %224 = vst.msk [vmem:[%s623_s14 + $0x18] sm:$0xff] %vm187_vm1, %v127_v5  ;;  %v135_v13 = vld [vmem:[%s618_s11 + $0x68] sm:$0xff]  ;;  %v136_v14 = vld [vmem:[%s618_s11 + $0x70] sm:$0xff] }
  0x15   : > { %519 = vst.msk [vmem:[%s623_s14 + $0x40] sm:$0xff] %vm119_vm0, %v128_v6  ;;  %520 = vst.msk [vmem:[%s623_s14 + $0x48] sm:$0xff] %vm119_vm0, %v129_v7  ;;  %v137_v15 = vld [vmem:[%s618_s11 + $0x78] sm:$0xff]  ;;  %v138_v16 = vld [vmem:[%s618_s11 + $0x80] sm:$0xff] }
  0x16   : > { %521 = vst.msk [vmem:[%s623_s14 + $0x50] sm:$0xff] %vm119_vm0, %v130_v8  ;;  %522 = vst.msk [vmem:[%s623_s14 + $0x58] sm:$0xff] %vm119_vm0, %v131_v9  ;;  %v139_v17 = vld [vmem:[%s618_s11 + $0x88] sm:$0xff]  ;;  %v140_v18 = vld [vmem:[%s618_s11 + $0x90] sm:$0xff] }
  0x17   : > { %225 = vst.msk [vmem:[%s623_s14 + $0x20] sm:$0xff] %vm187_vm1, %v128_v6  ;;  %226 = vst.msk [vmem:[%s623_s14 + $0x28] sm:$0xff] %vm187_vm1, %v129_v7  ;;  %v141_v19 = vld [vmem:[%s618_s11 + $0x98] sm:$0xff]  ;;  %v142_v20 = vld [vmem:[%s618_s11 + $0xa0] sm:$0xff] }
  0x18   : > { %227 = vst.msk [vmem:[%s623_s14 + $0x30] sm:$0xff] %vm187_vm1, %v130_v8  ;;  %228 = vst.msk [vmem:[%s623_s14 + $0x38] sm:$0xff] %vm187_vm1, %v131_v9  ;;  %v143_v21 = vld [vmem:[%s618_s11 + $0xa8] sm:$0xff]  ;;  %v144_v22 = vld [vmem:[%s618_s11 + $0xb0] sm:$0xff] }
  0x19   : > { %317 = vst.msk [vmem:[%s623_s14 + $0x1] sm:$0xff] %vm316_vm2, %v117_v0  ;;  %320 = vst.msk [vmem:[%s623_s14 + $0x11] sm:$0xff] %vm316_vm2, %v124_v2  ;;  %v145_v23 = vld [vmem:[%s618_s11 + $0xb8] sm:$0xff]  ;;  %v146_v24 = vld [vmem:[%s618_s11 + $0xc0] sm:$0xff] }
  0x1a   : > { %523 = vst.msk [vmem:[%s623_s14 + $0x60] sm:$0xff] %vm119_vm0, %v132_v10  ;;  %524 = vst.msk [vmem:[%s623_s14 + $0x68] sm:$0xff] %vm119_vm0, %v133_v11  ;;  %v147_v25 = vld [vmem:[%s618_s11 + $0xc8] sm:$0xff]  ;;  %v148_v26 = vld [vmem:[%s618_s11 + $0xd0] sm:$0xff] }
  0x1b   : > { %229 = vst.msk [vmem:[%s623_s14 + $0x40] sm:$0xff] %vm187_vm1, %v132_v10  ;;  %230 = vst.msk [vmem:[%s623_s14 + $0x48] sm:$0xff] %vm187_vm1, %v133_v11  ;;  %v149_v27 = vld [vmem:[%s618_s11 + $0xd8] sm:$0xff]  ;;  %v150_v28 = vld [vmem:[%s618_s11 + $0xe0] sm:$0xff] }
  0x1c   : > { %322 = vst.msk [vmem:[%s623_s14 + $0x21] sm:$0xff] %vm316_vm2, %v126_v4  ;;  %324 = vst.msk [vmem:[%s623_s14 + $0x31] sm:$0xff] %vm316_vm2, %v128_v6  ;;  %v151_v29 = vld [vmem:[%s618_s11 + $0xe8] sm:$0xff]  ;;  %v543_v30 = vld [vmem:[%s618_s11 + $0xf0] sm:$0xff] }
  0x1d   : > { %525 = vst.msk [vmem:[%s623_s14 + $0x70] sm:$0xff] %vm119_vm0, %v134_v12  ;;  %526 = vst.msk [vmem:[%s623_s14 + $0x78] sm:$0xff] %vm119_vm0, %v135_v13  ;;  %v544_v31 = vld [vmem:[%s618_s11 + $0xf8] sm:$0xff]  ;;  %v251_v32 = vld [vmem:[%s618_s11] sm:$0x1] }
  0x1e   : > { %527 = vst.msk [vmem:[%s623_s14 + $0x80] sm:$0xff] %vm119_vm0, %v136_v14  ;;  %528 = vst.msk [vmem:[%s623_s14 + $0x88] sm:$0xff] %vm119_vm0, %v137_v15  ;;  %v252_v33 = vld [vmem:[%s618_s11 + $0x10] sm:$0x1]  ;;  %v253_v34 = vld [vmem:[%s618_s11 + $0x20] sm:$0x1] }
  0x1f   : > { %231 = vst.msk [vmem:[%s623_s14 + $0x50] sm:$0xff] %vm187_vm1, %v134_v12  ;;  %232 = vst.msk [vmem:[%s623_s14 + $0x58] sm:$0xff] %vm187_vm1, %v135_v13  ;;  %v254_v35 = vld [vmem:[%s618_s11 + $0x30] sm:$0x1]  ;;  %v255_v36 = vld [vmem:[%s618_s11 + $0x40] sm:$0x1] }
  0x20   : > { %233 = vst.msk [vmem:[%s623_s14 + $0x60] sm:$0xff] %vm187_vm1, %v136_v14  ;;  %234 = vst.msk [vmem:[%s623_s14 + $0x68] sm:$0xff] %vm187_vm1, %v137_v15  ;;  %v256_v37 = vld [vmem:[%s618_s11 + $0x50] sm:$0x1]  ;;  %v257_v38 = vld [vmem:[%s618_s11 + $0x60] sm:$0x1] }
  0x21   : > { %326 = vst.msk [vmem:[%s623_s14 + $0x41] sm:$0xff] %vm316_vm2, %v130_v8  ;;  %328 = vst.msk [vmem:[%s623_s14 + $0x51] sm:$0xff] %vm316_vm2, %v132_v10  ;;  %v258_v39 = vld [vmem:[%s618_s11 + $0x70] sm:$0x1]  ;;  %v259_v40 = vld [vmem:[%s618_s11 + $0x80] sm:$0x1] }
  0x22   : > { %529 = vst.msk [vmem:[%s623_s14 + $0x90] sm:$0xff] %vm119_vm0, %v138_v16  ;;  %530 = vst.msk [vmem:[%s623_s14 + $0x98] sm:$0xff] %vm119_vm0, %v139_v17  ;;  %v260_v41 = vld [vmem:[%s618_s11 + $0x90] sm:$0x1]  ;;  %v261_v42 = vld [vmem:[%s618_s11 + $0xa0] sm:$0x1] }
  0x23   : > { %235 = vst.msk [vmem:[%s623_s14 + $0x70] sm:$0xff] %vm187_vm1, %v138_v16  ;;  %236 = vst.msk [vmem:[%s623_s14 + $0x78] sm:$0xff] %vm187_vm1, %v139_v17  ;;  %v262_v43 = vld [vmem:[%s618_s11 + $0xb0] sm:$0x1]  ;;  %v263_v44 = vld [vmem:[%s618_s11 + $0xc0] sm:$0x1] }
  0x24   : > { %531 = vst.msk [vmem:[%s623_s14 + $0xa0] sm:$0xff] %vm119_vm0, %v140_v18  ;;  %532 = vst.msk [vmem:[%s623_s14 + $0xa8] sm:$0xff] %vm119_vm0, %v141_v19  ;;  %v264_v45 = vld [vmem:[%s618_s11 + $0xd0] sm:$0x1]  ;;  %v265_v46 = vld [vmem:[%s618_s11 + $0xe0] sm:$0x1] }
  0x25   : > { %533 = vst.msk [vmem:[%s623_s14 + $0xb0] sm:$0xff] %vm119_vm0, %v142_v20  ;;  %534 = vst.msk [vmem:[%s623_s14 + $0xb8] sm:$0xff] %vm119_vm0, %v143_v21  ;;  %v266_v47 = vld [vmem:[%s618_s11 + $0xf0] sm:$0x1]  ;;  %v285_v48 = vld [vmem:[%s618_s11 + $0x8] sm:$0x7f] }
  0x26   : > { %237 = vst.msk [vmem:[%s623_s14 + $0x80] sm:$0xff] %vm187_vm1, %v140_v18  ;;  %238 = vst.msk [vmem:[%s623_s14 + $0x88] sm:$0xff] %vm187_vm1, %v141_v19  ;;  %v287_v49 = vld [vmem:[%s618_s11 + $0x18] sm:$0x7f]  ;;  %v289_v50 = vld [vmem:[%s618_s11 + $0x28] sm:$0x7f] }
  0x27   : > { %239 = vst.msk [vmem:[%s623_s14 + $0x90] sm:$0xff] %vm187_vm1, %v142_v20  ;;  %240 = vst.msk [vmem:[%s623_s14 + $0x98] sm:$0xff] %vm187_vm1, %v143_v21  ;;  %v291_v51 = vld [vmem:[%s618_s11 + $0x38] sm:$0x7f]  ;;  %v293_v52 = vld [vmem:[%s618_s11 + $0x48] sm:$0x7f] }
  0x28   : > { %330 = vst.msk [vmem:[%s623_s14 + $0x61] sm:$0xff] %vm316_vm2, %v134_v12  ;;  %332 = vst.msk [vmem:[%s623_s14 + $0x71] sm:$0xff] %vm316_vm2, %v136_v14  ;;  %v295_v53 = vld [vmem:[%s618_s11 + $0x58] sm:$0x7f]  ;;  %v297_v54 = vld [vmem:[%s618_s11 + $0x68] sm:$0x7f] }
  0x29   : > { %535 = vst.msk [vmem:[%s623_s14 + $0xc0] sm:$0xff] %vm119_vm0, %v144_v22  ;;  %536 = vst.msk [vmem:[%s623_s14 + $0xc8] sm:$0xff] %vm119_vm0, %v145_v23  ;;  %v299_v55 = vld [vmem:[%s618_s11 + $0x78] sm:$0x7f]  ;;  %v301_v56 = vld [vmem:[%s618_s11 + $0x88] sm:$0x7f] }
  0x2a   : > { %241 = vst.msk [vmem:[%s623_s14 + $0xa0] sm:$0xff] %vm187_vm1, %v144_v22  ;;  %242 = vst.msk [vmem:[%s623_s14 + $0xa8] sm:$0xff] %vm187_vm1, %v145_v23  ;;  %v303_v57 = vld [vmem:[%s618_s11 + $0x98] sm:$0x7f]  ;;  %v305_v58 = vld [vmem:[%s618_s11 + $0xa8] sm:$0x7f] }
  0x2b   : > { %334 = vst.msk [vmem:[%s623_s14 + $0x81] sm:$0xff] %vm316_vm2, %v138_v16  ;;  %336 = vst.msk [vmem:[%s623_s14 + $0x91] sm:$0xff] %vm316_vm2, %v140_v18  ;;  %v307_v59 = vld [vmem:[%s618_s11 + $0xb8] sm:$0x7f]  ;;  %v309_v60 = vld [vmem:[%s618_s11 + $0xc8] sm:$0x7f] }
  0x2c   : > { %537 = vst.msk [vmem:[%s623_s14 + $0xd0] sm:$0xff] %vm119_vm0, %v146_v24  ;;  %538 = vst.msk [vmem:[%s623_s14 + $0xd8] sm:$0xff] %vm119_vm0, %v147_v25  ;;  %v311_v61 = vld [vmem:[%s618_s11 + $0xd8] sm:$0x7f]  ;;  %v313_v62 = vld [vmem:[%s618_s11 + $0xe8] sm:$0x7f] }
  0x2d   : > { %539 = vst.msk [vmem:[%s623_s14 + $0xe0] sm:$0xff] %vm119_vm0, %v148_v26  ;;  %540 = vst.msk [vmem:[%s623_s14 + $0xe8] sm:$0xff] %vm119_vm0, %v149_v27  ;;  %v315_v63 = vld [vmem:[%s618_s11 + $0xf8] sm:$0x7f]  ;;  %v350_v0 = vld [vmem:[%s618_s11 + $0xf] sm:$0x1] }
  0x2e   : > { %243 = vst.msk [vmem:[%s623_s14 + $0xb0] sm:$0xff] %vm187_vm1, %v146_v24  ;;  %244 = vst.msk [vmem:[%s623_s14 + $0xb8] sm:$0xff] %vm187_vm1, %v147_v25  ;;  %v351_v1 = vld [vmem:[%s618_s11 + $0x1f] sm:$0x1]  ;;  %v352_v2 = vld [vmem:[%s618_s11 + $0x2f] sm:$0x1] }
  0x2f   : > { %245 = vst.msk [vmem:[%s623_s14 + $0xc0] sm:$0xff] %vm187_vm1, %v148_v26  ;;  %246 = vst.msk [vmem:[%s623_s14 + $0xc8] sm:$0xff] %vm187_vm1, %v149_v27  ;;  %v353_v3 = vld [vmem:[%s618_s11 + $0x3f] sm:$0x1]  ;;  %v354_v4 = vld [vmem:[%s618_s11 + $0x4f] sm:$0x1] }
  0x30   : > { %338 = vst.msk [vmem:[%s623_s14 + $0xa1] sm:$0xff] %vm316_vm2, %v142_v20  ;;  %340 = vst.msk [vmem:[%s623_s14 + $0xb1] sm:$0xff] %vm316_vm2, %v144_v22  ;;  %v355_v5 = vld [vmem:[%s618_s11 + $0x5f] sm:$0x1]  ;;  %v356_v6 = vld [vmem:[%s618_s11 + $0x6f] sm:$0x1] }
  0x31   : > { %541 = vst.msk [vmem:[%s623_s14 + $0xf0] sm:$0xff] %vm119_vm0, %v150_v28  ;;  %542 = vst.msk [vmem:[%s623_s14 + $0xf8] sm:$0xff] %vm119_vm0, %v151_v29  ;;  %v357_v7 = vld [vmem:[%s618_s11 + $0x7f] sm:$0x1]  ;;  %v358_v8 = vld [vmem:[%s618_s11 + $0x8f] sm:$0x1] }
  0x32   : > { %247 = vst.msk [vmem:[%s623_s14 + $0xd0] sm:$0xff] %vm187_vm1, %v150_v28  ;;  %248 = vst.msk [vmem:[%s623_s14 + $0xd8] sm:$0xff] %vm187_vm1, %v151_v29  ;;  %v359_v9 = vld [vmem:[%s618_s11 + $0x9f] sm:$0x1]  ;;  %v360_v10 = vld [vmem:[%s618_s11 + $0xaf] sm:$0x1] }
  0x33   : > { %545 = vst.msk [vmem:[%s623_s14 + $0xf0] sm:$0xff] %vm187_vm1, %v543_v30  ;;  %546 = vst.msk [vmem:[%s623_s14 + $0xf8] sm:$0xff] %vm187_vm1, %v544_v31  ;;  %v361_v11 = vld [vmem:[%s618_s11 + $0xbf] sm:$0x1]  ;;  %v362_v12 = vld [vmem:[%s618_s11 + $0xcf] sm:$0x1] }
  0x34   : > { %249 = vst.msk [vmem:[%s623_s14 + $0xe0] sm:$0xff] %vm187_vm1, %v543_v30  ;;  %250 = vst.msk [vmem:[%s623_s14 + $0xe8] sm:$0xff] %vm187_vm1, %v544_v31  ;;  %v363_v13 = vld [vmem:[%s618_s11 + $0xdf] sm:$0x1]  ;;  %v364_v14 = vld [vmem:[%s618_s11 + $0xef] sm:$0x1] }
  0x35   : > { %268 = vst.msk [vmem:[%s623_s14] sm:$0x1] %vm267_vm3, %v251_v32  ;;  %269 = vst.msk [vmem:[%s623_s14 + $0x10] sm:$0x1] %vm267_vm3, %v252_v33  ;;  %v365_v15 = vld [vmem:[%s618_s11 + $0xff] sm:$0x1] }
  0x36   : > { %342 = vst.msk [vmem:[%s623_s14 + $0xc1] sm:$0xff] %vm316_vm2, %v146_v24  ;;  %344 = vst.msk [vmem:[%s623_s14 + $0xd1] sm:$0xff] %vm316_vm2, %v148_v26  ;;  %v383_v16 = vld [vmem:[%s618_s11 + $0x1] sm:$0xff]  ;;  %v384_v17 = vld [vmem:[%s618_s11 + $0x9] sm:$0x7f] }
  0x37   : > { %270 = vst.msk [vmem:[%s623_s14 + $0x20] sm:$0x1] %vm267_vm3, %v253_v34  ;;  %271 = vst.msk [vmem:[%s623_s14 + $0x30] sm:$0x1] %vm267_vm3, %v254_v35  ;;  %v385_v18 = vld [vmem:[%s618_s11 + $0x11] sm:$0xff]  ;;  %v387_v20 = vld [vmem:[%s618_s11 + $0x21] sm:$0xff] }
  0x38   : > { %346 = vst.msk [vmem:[%s623_s14 + $0xe1] sm:$0xff] %vm316_vm2, %v150_v28  ;;  %348 = vst.msk [vmem:[%s623_s14 + $0xf1] sm:$0xff] %vm316_vm2, %v543_v30  ;;  %v386_v19 = vld [vmem:[%s618_s11 + $0x19] sm:$0x7f]  ;;  %v388_v21 = vld [vmem:[%s618_s11 + $0x29] sm:$0x7f] }
  0x39   : > { %272 = vst.msk [vmem:[%s623_s14 + $0x40] sm:$0x1] %vm267_vm3, %v255_v36  ;;  %273 = vst.msk [vmem:[%s623_s14 + $0x50] sm:$0x1] %vm267_vm3, %v256_v37  ;;  %v389_v22 = vld [vmem:[%s618_s11 + $0x31] sm:$0xff]  ;;  %v391_v24 = vld [vmem:[%s618_s11 + $0x41] sm:$0xff] }
  0x3a   : > { %274 = vst.msk [vmem:[%s623_s14 + $0x60] sm:$0x1] %vm267_vm3, %v257_v38  ;;  %275 = vst.msk [vmem:[%s623_s14 + $0x70] sm:$0x1] %vm267_vm3, %v258_v39  ;;  %v390_v23 = vld [vmem:[%s618_s11 + $0x39] sm:$0x7f] }
  0x3b   : > { %276 = vst.msk [vmem:[%s623_s14 + $0x80] sm:$0x1] %vm267_vm3, %v259_v40  ;;  %277 = vst.msk [vmem:[%s623_s14 + $0x90] sm:$0x1] %vm267_vm3, %v260_v41  ;;  %v392_v25 = vld [vmem:[%s618_s11 + $0x49] sm:$0x7f] }
  0x3c   : > { %278 = vst.msk [vmem:[%s623_s14 + $0xa0] sm:$0x1] %vm267_vm3, %v261_v42  ;;  %279 = vst.msk [vmem:[%s623_s14 + $0xb0] sm:$0x1] %vm267_vm3, %v262_v43  ;;  %v393_v26 = vld [vmem:[%s618_s11 + $0x51] sm:$0xff]  ;;  %v395_v28 = vld [vmem:[%s618_s11 + $0x61] sm:$0xff] }
  0x3d   : > { %280 = vst.msk [vmem:[%s623_s14 + $0xc0] sm:$0x1] %vm267_vm3, %v263_v44  ;;  %281 = vst.msk [vmem:[%s623_s14 + $0xd0] sm:$0x1] %vm267_vm3, %v264_v45  ;;  %v394_v27 = vld [vmem:[%s618_s11 + $0x59] sm:$0x7f] }
  0x3e   : > { %282 = vst.msk [vmem:[%s623_s14 + $0xe0] sm:$0x1] %vm267_vm3, %v265_v46  ;;  %283 = vst.msk [vmem:[%s623_s14 + $0xf0] sm:$0x1] %vm267_vm3, %v266_v47  ;;  %v396_v29 = vld [vmem:[%s618_s11 + $0x69] sm:$0x7f] }
  0x3f   : > { %319 = vst.msk [vmem:[%s623_s14 + $0x9] sm:$0x7f] %vm318_vm4, %v285_v48  ;;  %321 = vst.msk [vmem:[%s623_s14 + $0x19] sm:$0x7f] %vm318_vm4, %v287_v49  ;;  %v397_v30 = vld [vmem:[%s618_s11 + $0x71] sm:$0xff]  ;;  %v399_v32 = vld [vmem:[%s618_s11 + $0x81] sm:$0xff] }
  0x40   : > { %323 = vst.msk [vmem:[%s623_s14 + $0x29] sm:$0x7f] %vm318_vm4, %v289_v50  ;;  %325 = vst.msk [vmem:[%s623_s14 + $0x39] sm:$0x7f] %vm318_vm4, %v291_v51  ;;  %v398_v31 = vld [vmem:[%s618_s11 + $0x79] sm:$0x7f] }
  0x41   : > { %327 = vst.msk [vmem:[%s623_s14 + $0x49] sm:$0x7f] %vm318_vm4, %v293_v52  ;;  %329 = vst.msk [vmem:[%s623_s14 + $0x59] sm:$0x7f] %vm318_vm4, %v295_v53  ;;  %v400_v33 = vld [vmem:[%s618_s11 + $0x89] sm:$0x7f] }
  0x42   : > { %331 = vst.msk [vmem:[%s623_s14 + $0x69] sm:$0x7f] %vm318_vm4, %v297_v54  ;;  %333 = vst.msk [vmem:[%s623_s14 + $0x79] sm:$0x7f] %vm318_vm4, %v299_v55  ;;  %v401_v34 = vld [vmem:[%s618_s11 + $0x91] sm:$0xff]  ;;  %v403_v36 = vld [vmem:[%s618_s11 + $0xa1] sm:$0xff] }
  0x43   : > { %335 = vst.msk [vmem:[%s623_s14 + $0x89] sm:$0x7f] %vm318_vm4, %v301_v56  ;;  %337 = vst.msk [vmem:[%s623_s14 + $0x99] sm:$0x7f] %vm318_vm4, %v303_v57  ;;  %v402_v35 = vld [vmem:[%s618_s11 + $0x99] sm:$0x7f] }
  0x44   : > { %339 = vst.msk [vmem:[%s623_s14 + $0xa9] sm:$0x7f] %vm318_vm4, %v305_v58  ;;  %341 = vst.msk [vmem:[%s623_s14 + $0xb9] sm:$0x7f] %vm318_vm4, %v307_v59  ;;  %v404_v37 = vld [vmem:[%s618_s11 + $0xa9] sm:$0x7f] }
  0x45   : > { %343 = vst.msk [vmem:[%s623_s14 + $0xc9] sm:$0x7f] %vm318_vm4, %v309_v60  ;;  %345 = vst.msk [vmem:[%s623_s14 + $0xd9] sm:$0x7f] %vm318_vm4, %v311_v61  ;;  %v405_v38 = vld [vmem:[%s618_s11 + $0xb1] sm:$0xff]  ;;  %v407_v40 = vld [vmem:[%s618_s11 + $0xc1] sm:$0xff] }
  0x46   : > { %347 = vst.msk [vmem:[%s623_s14 + $0xe9] sm:$0x7f] %vm318_vm4, %v313_v62  ;;  %349 = vst.msk [vmem:[%s623_s14 + $0xf9] sm:$0x7f] %vm318_vm4, %v315_v63  ;;  %v406_v39 = vld [vmem:[%s618_s11 + $0xb9] sm:$0x7f] }
  0x47   : > { %367 = vst.msk [vmem:[%s623_s14 + $0xf] sm:$0x1] %vm366_vm5, %v350_v0  ;;  %368 = vst.msk [vmem:[%s623_s14 + $0x1f] sm:$0x1] %vm366_vm5, %v351_v1  ;;  %v408_v41 = vld [vmem:[%s618_s11 + $0xc9] sm:$0x7f] }
  0x48   : > { %369 = vst.msk [vmem:[%s623_s14 + $0x2f] sm:$0x1] %vm366_vm5, %v352_v2  ;;  %370 = vst.msk [vmem:[%s623_s14 + $0x3f] sm:$0x1] %vm366_vm5, %v353_v3  ;;  %v409_v42 = vld [vmem:[%s618_s11 + $0xd1] sm:$0xff]  ;;  %v411_v44 = vld [vmem:[%s618_s11 + $0xe1] sm:$0xff] }
  0x49   : > { %371 = vst.msk [vmem:[%s623_s14 + $0x4f] sm:$0x1] %vm366_vm5, %v354_v4  ;;  %372 = vst.msk [vmem:[%s623_s14 + $0x5f] sm:$0x1] %vm366_vm5, %v355_v5  ;;  %v410_v43 = vld [vmem:[%s618_s11 + $0xd9] sm:$0x7f] }
  0x4a   : > { %373 = vst.msk [vmem:[%s623_s14 + $0x6f] sm:$0x1] %vm366_vm5, %v356_v6  ;;  %374 = vst.msk [vmem:[%s623_s14 + $0x7f] sm:$0x1] %vm366_vm5, %v357_v7  ;;  %v412_v45 = vld [vmem:[%s618_s11 + $0xe9] sm:$0x7f] }
  0x4b   : > { %375 = vst.msk [vmem:[%s623_s14 + $0x8f] sm:$0x1] %vm366_vm5, %v358_v8  ;;  %376 = vst.msk [vmem:[%s623_s14 + $0x9f] sm:$0x1] %vm366_vm5, %v359_v9  ;;  %v413_v46 = vld [vmem:[%s618_s11 + $0xf1] sm:$0xff] }
  0x4c   : > { %377 = vst.msk [vmem:[%s623_s14 + $0xaf] sm:$0x1] %vm366_vm5, %v360_v10  ;;  %378 = vst.msk [vmem:[%s623_s14 + $0xbf] sm:$0x1] %vm366_vm5, %v361_v11  ;;  %v414_v47 = vld [vmem:[%s618_s11 + $0xf9] sm:$0x7f] }
  0x4d   : > { %379 = vst.msk [vmem:[%s623_s14 + $0xcf] sm:$0x1] %vm366_vm5, %v362_v12  ;;  %380 = vst.msk [vmem:[%s623_s14 + $0xdf] sm:$0x1] %vm366_vm5, %v363_v13 }
  0x4e   : > { %381 = vst.msk [vmem:[%s623_s14 + $0xef] sm:$0x1] %vm366_vm5, %v364_v14  ;;  %382 = vst.msk [vmem:[%s623_s14 + $0xff] sm:$0x1] %vm366_vm5, %v365_v15 }
  0x4f   : > { %416 = vst.msk [vmem:[%s623_s14] sm:$0xff] %vm415_vm6, %v383_v16  ;;  %419 = vst.msk [vmem:[%s623_s14 + $0x10] sm:$0xff] %vm415_vm6, %v385_v18 }
  0x50   : > { %418 = vst.msk [vmem:[%s623_s14 + $0x8] sm:$0x7f] %vm417_vm7, %v384_v17  ;;  %420 = vst.msk [vmem:[%s623_s14 + $0x18] sm:$0x7f] %vm417_vm7, %v386_v19 }
  0x51   : > { %421 = vst.msk [vmem:[%s623_s14 + $0x20] sm:$0xff] %vm415_vm6, %v387_v20  ;;  %423 = vst.msk [vmem:[%s623_s14 + $0x30] sm:$0xff] %vm415_vm6, %v389_v22 }
  0x52   : > { %422 = vst.msk [vmem:[%s623_s14 + $0x28] sm:$0x7f] %vm417_vm7, %v388_v21  ;;  %424 = vst.msk [vmem:[%s623_s14 + $0x38] sm:$0x7f] %vm417_vm7, %v390_v23 }
  0x53   : > { %425 = vst.msk [vmem:[%s623_s14 + $0x40] sm:$0xff] %vm415_vm6, %v391_v24  ;;  %427 = vst.msk [vmem:[%s623_s14 + $0x50] sm:$0xff] %vm415_vm6, %v393_v26 }
  0x54   : > { %426 = vst.msk [vmem:[%s623_s14 + $0x48] sm:$0x7f] %vm417_vm7, %v392_v25  ;;  %428 = vst.msk [vmem:[%s623_s14 + $0x58] sm:$0x7f] %vm417_vm7, %v394_v27 }
  0x55   : > { %429 = vst.msk [vmem:[%s623_s14 + $0x60] sm:$0xff] %vm415_vm6, %v395_v28  ;;  %431 = vst.msk [vmem:[%s623_s14 + $0x70] sm:$0xff] %vm415_vm6, %v397_v30 }
  0x56   : > { %430 = vst.msk [vmem:[%s623_s14 + $0x68] sm:$0x7f] %vm417_vm7, %v396_v29  ;;  %432 = vst.msk [vmem:[%s623_s14 + $0x78] sm:$0x7f] %vm417_vm7, %v398_v31 }
  0x57   : > { %433 = vst.msk [vmem:[%s623_s14 + $0x80] sm:$0xff] %vm415_vm6, %v399_v32  ;;  %435 = vst.msk [vmem:[%s623_s14 + $0x90] sm:$0xff] %vm415_vm6, %v401_v34 }
  0x58   : > { %434 = vst.msk [vmem:[%s623_s14 + $0x88] sm:$0x7f] %vm417_vm7, %v400_v33  ;;  %436 = vst.msk [vmem:[%s623_s14 + $0x98] sm:$0x7f] %vm417_vm7, %v402_v35 }
  0x59   : > { %437 = vst.msk [vmem:[%s623_s14 + $0xa0] sm:$0xff] %vm415_vm6, %v403_v36  ;;  %439 = vst.msk [vmem:[%s623_s14 + $0xb0] sm:$0xff] %vm415_vm6, %v405_v38 }
  0x5a   : > { %438 = vst.msk [vmem:[%s623_s14 + $0xa8] sm:$0x7f] %vm417_vm7, %v404_v37  ;;  %440 = vst.msk [vmem:[%s623_s14 + $0xb8] sm:$0x7f] %vm417_vm7, %v406_v39 }
  0x5b   : > { %441 = vst.msk [vmem:[%s623_s14 + $0xc0] sm:$0xff] %vm415_vm6, %v407_v40  ;;  %443 = vst.msk [vmem:[%s623_s14 + $0xd0] sm:$0xff] %vm415_vm6, %v409_v42 }
  0x5c   : > { %442 = vst.msk [vmem:[%s623_s14 + $0xc8] sm:$0x7f] %vm417_vm7, %v408_v41  ;;  %444 = vst.msk [vmem:[%s623_s14 + $0xd8] sm:$0x7f] %vm417_vm7, %v410_v43 }
  0x5d   : > { %445 = vst.msk [vmem:[%s623_s14 + $0xe0] sm:$0xff] %vm415_vm6, %v411_v44  ;;  %447 = vst.msk [vmem:[%s623_s14 + $0xf0] sm:$0xff] %vm415_vm6, %v413_v46 }
  0x5e   : > { %446 = vst.msk [vmem:[%s623_s14 + $0xe8] sm:$0x7f] %vm417_vm7, %v412_v45  ;;  %448 = vst.msk [vmem:[%s623_s14 + $0xf8] sm:$0x7f] %vm417_vm7, %v414_v47 }
  0x5f PF: > { %s11_s6 = sadd.s32 1, %s595_s6  }
  0x60   : > { %p8_p4 = scmp.ge.s32.totalorder %s11_s6, 4  }
  0x62   :  { %10 = sbr.rel (!%p8_p4) target bundleno = 1 (0x1), region = 58 }

</bundles_post_ra>
